<compile_context>
chip_gen: v7x
topology: tpu7x:2x2x1
jax: 0.10.0
libtpu: 0.0.40
codegen_flags: <defaults>
</compile_context>

<pallas_src>
import jax
import jax.numpy as jnp
import numpy as np
from jax import lax
from jax.experimental import pallas as pl
from jax.experimental.pallas import tpu as pltpu

# ---- problem sizes (small, consistent with the module) ----
N, CI, H, W = 2, 3, 16, 16
CO, KH, KW = 3, 3, 3
OH, OW = H - KH + 1, W - KW + 1            # valid conv, stride 1 -> 14 x 14
HW = H * W                                 # 256 flat spatial positions (2 x 128 lanes)
NTAP = KH * KW                             # 9
SHIFTS = tuple(kh * W + kw for kh in range(KH) for kw in range(KW))   # flat tap offsets
MAX_SHIFT = SHIFTS[-1]                     # 34

# Lane rolls wrap modulo HW. Guarantee wrapped data only lands in lanes that the
# wrapper crops away: max valid flat index + max shift must stay inside one image.
assert (OH - 1) * W + (OW - 1) + MAX_SHIFT < HW, "flat-shift trick would wrap into valid output"
assert HW % 128 == 0, "output rows must stay lane-dense (multiple of 128)"


def conv2d_kernel(x_ref, w_ref, b_ref, o_ref):
    """Fused im2col (lane rolls) + MXU matmul 3x3 valid conv.

    x_ref: (N*CI, HW)        f32 VMEM  -- row n*CI+ci, lane i*W+j  (flat NCHW image)
    w_ref: (CO, CI*KH*KW)    f32 VMEM  -- PyTorch OIHW weights flattened (ci-major)
    b_ref: (CO, 1)           f32 VMEM
    o_ref: (N*CO, HW)        f32 VMEM  -- row n*CO+co, lane i*W+j ("same" layout; wrapper crops)
    """
    x = x_ref[...]                       # (N*CI, HW)
    w2d = w_ref[...]                     # (CO, 27)
    bias = b_ref[...]                    # (CO, 1)

    # 9 static lane rotations build all shifted taps for every (image, channel) row
    # at once: rolled[t][r, m] == x[r, m + SHIFTS[t]] for all lanes m that survive the
    # crop (wrap-around only touches cropped lanes).  Pure XLU work.
    rolled = [x if s == 0 else pltpu.roll(x, HW - s, 1) for s in SHIFTS]

    outs = []
    for n in range(N):                                       # unrolled, N = 2
        # (CI*KH*KW, HW) tap matrix, row order ci*9 + kh*3 + kw to match OIHW weights.
        taps = jnp.concatenate(
            [rolled[t][n * CI + ci:n * CI + ci + 1, :]
             for ci in range(CI) for t in range(NTAP)],
            axis=0)
        # One small MXU matmul: (3, 27) x (27, 256) -> (3, 256), f32 accumulation.
        outs.append(jnp.dot(w2d, taps, preferred_element_type=jnp.float32) + bias)

    # Single lane-dense store, already in (N, CO, HW) row order -> wrapper only reshapes.
    o_ref[...] = jnp.concatenate(outs, axis=0)               # (N*CO, HW)


@jax.jit
def conv2d_3x3(x, w, b):
    """x: (N,CI,H,W) f32, w: (CO,CI,3,3) f32, b: (CO,) f32 -> (N,CO,OH,OW) f32."""
    # All pre/post-kernel ops are metadata-only reshapes plus the final valid-window crop.
    x2 = x.reshape(N * CI, HW)              # row-major compatible: pure bitcast
    w2 = w.reshape(CO, CI * KH * KW)        # OIHW flatten: pure bitcast
    b2 = b.reshape(CO, 1)

    out_flat = pl.pallas_call(
        conv2d_kernel,
        out_shape=jax.ShapeDtypeStruct((N * CO, HW), jnp.float32),
        in_specs=[
            pl.BlockSpec(memory_space=pltpu.MemorySpace.VMEM),   # flat image
            pl.BlockSpec(memory_space=pltpu.MemorySpace.VMEM),   # weight tile
            pl.BlockSpec(memory_space=pltpu.MemorySpace.VMEM),   # bias
        ],
        out_specs=pl.BlockSpec(memory_space=pltpu.MemorySpace.VMEM),
        cost_estimate=pl.CostEstimate(
            flops=2 * N * CO * CI * KH * KW * OH * OW,
            transcendentals=0,
            bytes_accessed=4 * (N * CI * HW + CO * CI * KH * KW + CO + N * CO * HW)),
    )(x2, w2, b2)

    # (N*CO, HW) row-major == (N, CO, H, W) row-major -> reshape is metadata only;
    # then crop the valid 14x14 window (lanes >= valid region hold wrapped garbage).
    return out_flat.reshape(N, CO, H, W)[:, :, :OH, :OW]


def init_params(key):
    """Deterministic init mimicking PyTorch Conv2d default (uniform +-1/sqrt(fan_in))."""
    kw_, kb_ = jax.random.split(key)
    fan_in = CI * KH * KW
    bound = 1.0 / np.sqrt(fan_in)
    w = jax.random.uniform(kw_, (CO, CI, KH, KW), jnp.float32, -bound, bound)
    b = jax.random.uniform(kb_, (CO,), jnp.float32, -bound, bound)
    return w, b


if __name__ == "__main__":
    key = jax.random.PRNGKey(0)
    kx, kp = jax.random.split(key)
    x = jax.random.normal(kx, (N, CI, H, W), jnp.float32)
    w, b = init_params(kp)

    # Round inputs/params to bf16-representable f32 values so the tight correctness
    # check is independent of which f32 MXU pass strategy (1-pass bf16 vs multi-pass)
    # the compiler picks for the in-kernel dot.
    rnd = lambda a: a.astype(jnp.bfloat16).astype(jnp.float32)
    x, w, b = rnd(x), rnd(w), rnd(b)

    y = jax.block_until_ready(conv2d_3x3(x, w, b))
    assert y.shape == (N, CO, OH, OW)

    # Reference check against XLA's conv (same NCHW / OIHW convention as PyTorch).
    y_ref = lax.conv_general_dilated(
        x, w, window_strides=(1, 1), padding="VALID",
        dimension_numbers=("NCHW", "OIHW", "NCHW"),
        precision=jax.lax.Precision.HIGHEST) + b[None, :, None, None]
    np.testing.assert_allclose(np.asarray(y), np.asarray(y_ref), rtol=1e-5, atol=1e-5)

    print("KERNEL_OK")
</pallas_src>

<mosaic_0001>
module attributes {stable_mosaic.version = 11 : i64} {
  func.func @conv2d_kernel(%arg0: memref<6x256xf32, #tpu.memory_space<vmem>>, %arg1: memref<3x27xf32, #tpu.memory_space<vmem>>, %arg2: memref<3x1xf32, #tpu.memory_space<vmem>>, %arg3: memref<6x256xf32, #tpu.memory_space<vmem>>) attributes {dimension_semantics = [], scalar_prefetch = 0 : i64, scratch_operands = 0 : i64, tpu.core_type = #tpu.core_type<tc>} {
    %c0 = arith.constant 0 : index
    %c0_0 = arith.constant 0 : index
    %0 = vector.load %arg0[%c0, %c0_0] : memref<6x256xf32, #tpu.memory_space<vmem>>, vector<6x256xf32>
    %c0_1 = arith.constant 0 : index
    %c0_2 = arith.constant 0 : index
    %1 = vector.load %arg1[%c0_1, %c0_2] : memref<3x27xf32, #tpu.memory_space<vmem>>, vector<3x27xf32>
    %c0_3 = arith.constant 0 : index
    %c0_4 = arith.constant 0 : index
    %2 = vector.load %arg2[%c0_3, %c0_4] : memref<3x1xf32, #tpu.memory_space<vmem>>, vector<3x1xf32>
    %c255_i32 = arith.constant 255 : i32
    %3 = tpu.dynamic_rotate %0 by %c255_i32 dim 1 : vector<6x256xf32>, i32 -> vector<6x256xf32>
    %c254_i32 = arith.constant 254 : i32
    %4 = tpu.dynamic_rotate %0 by %c254_i32 dim 1 : vector<6x256xf32>, i32 -> vector<6x256xf32>
    %c240_i32 = arith.constant 240 : i32
    %5 = tpu.dynamic_rotate %0 by %c240_i32 dim 1 : vector<6x256xf32>, i32 -> vector<6x256xf32>
    %c239_i32 = arith.constant 239 : i32
    %6 = tpu.dynamic_rotate %0 by %c239_i32 dim 1 : vector<6x256xf32>, i32 -> vector<6x256xf32>
    %c238_i32 = arith.constant 238 : i32
    %7 = tpu.dynamic_rotate %0 by %c238_i32 dim 1 : vector<6x256xf32>, i32 -> vector<6x256xf32>
    %c224_i32 = arith.constant 224 : i32
    %8 = tpu.dynamic_rotate %0 by %c224_i32 dim 1 : vector<6x256xf32>, i32 -> vector<6x256xf32>
    %c223_i32 = arith.constant 223 : i32
    %9 = tpu.dynamic_rotate %0 by %c223_i32 dim 1 : vector<6x256xf32>, i32 -> vector<6x256xf32>
    %c222_i32 = arith.constant 222 : i32
    %10 = tpu.dynamic_rotate %0 by %c222_i32 dim 1 : vector<6x256xf32>, i32 -> vector<6x256xf32>
    %11 = vector.extract_strided_slice %0 {offsets = [0, 0], sizes = [1, 256], strides = [1, 1]} : vector<6x256xf32> to vector<1x256xf32>
    %12 = vector.extract_strided_slice %3 {offsets = [0, 0], sizes = [1, 256], strides = [1, 1]} : vector<6x256xf32> to vector<1x256xf32>
    %13 = vector.extract_strided_slice %4 {offsets = [0, 0], sizes = [1, 256], strides = [1, 1]} : vector<6x256xf32> to vector<1x256xf32>
    %14 = vector.extract_strided_slice %5 {offsets = [0, 0], sizes = [1, 256], strides = [1, 1]} : vector<6x256xf32> to vector<1x256xf32>
    %15 = vector.extract_strided_slice %6 {offsets = [0, 0], sizes = [1, 256], strides = [1, 1]} : vector<6x256xf32> to vector<1x256xf32>
    %16 = vector.extract_strided_slice %7 {offsets = [0, 0], sizes = [1, 256], strides = [1, 1]} : vector<6x256xf32> to vector<1x256xf32>
    %17 = vector.extract_strided_slice %8 {offsets = [0, 0], sizes = [1, 256], strides = [1, 1]} : vector<6x256xf32> to vector<1x256xf32>
    %18 = vector.extract_strided_slice %9 {offsets = [0, 0], sizes = [1, 256], strides = [1, 1]} : vector<6x256xf32> to vector<1x256xf32>
    %19 = vector.extract_strided_slice %10 {offsets = [0, 0], sizes = [1, 256], strides = [1, 1]} : vector<6x256xf32> to vector<1x256xf32>
    %20 = vector.extract_strided_slice %0 {offsets = [1, 0], sizes = [1, 256], strides = [1, 1]} : vector<6x256xf32> to vector<1x256xf32>
    %21 = vector.extract_strided_slice %3 {offsets = [1, 0], sizes = [1, 256], strides = [1, 1]} : vector<6x256xf32> to vector<1x256xf32>
    %22 = vector.extract_strided_slice %4 {offsets = [1, 0], sizes = [1, 256], strides = [1, 1]} : vector<6x256xf32> to vector<1x256xf32>
    %23 = vector.extract_strided_slice %5 {offsets = [1, 0], sizes = [1, 256], strides = [1, 1]} : vector<6x256xf32> to vector<1x256xf32>
    %24 = vector.extract_strided_slice %6 {offsets = [1, 0], sizes = [1, 256], strides = [1, 1]} : vector<6x256xf32> to vector<1x256xf32>
    %25 = vector.extract_strided_slice %7 {offsets = [1, 0], sizes = [1, 256], strides = [1, 1]} : vector<6x256xf32> to vector<1x256xf32>
    %26 = vector.extract_strided_slice %8 {offsets = [1, 0], sizes = [1, 256], strides = [1, 1]} : vector<6x256xf32> to vector<1x256xf32>
    %27 = vector.extract_strided_slice %9 {offsets = [1, 0], sizes = [1, 256], strides = [1, 1]} : vector<6x256xf32> to vector<1x256xf32>
    %28 = vector.extract_strided_slice %10 {offsets = [1, 0], sizes = [1, 256], strides = [1, 1]} : vector<6x256xf32> to vector<1x256xf32>
    %29 = vector.extract_strided_slice %0 {offsets = [2, 0], sizes = [1, 256], strides = [1, 1]} : vector<6x256xf32> to vector<1x256xf32>
    %30 = vector.extract_strided_slice %3 {offsets = [2, 0], sizes = [1, 256], strides = [1, 1]} : vector<6x256xf32> to vector<1x256xf32>
    %31 = vector.extract_strided_slice %4 {offsets = [2, 0], sizes = [1, 256], strides = [1, 1]} : vector<6x256xf32> to vector<1x256xf32>
    %32 = vector.extract_strided_slice %5 {offsets = [2, 0], sizes = [1, 256], strides = [1, 1]} : vector<6x256xf32> to vector<1x256xf32>
    %33 = vector.extract_strided_slice %6 {offsets = [2, 0], sizes = [1, 256], strides = [1, 1]} : vector<6x256xf32> to vector<1x256xf32>
    %34 = vector.extract_strided_slice %7 {offsets = [2, 0], sizes = [1, 256], strides = [1, 1]} : vector<6x256xf32> to vector<1x256xf32>
    %35 = vector.extract_strided_slice %8 {offsets = [2, 0], sizes = [1, 256], strides = [1, 1]} : vector<6x256xf32> to vector<1x256xf32>
    %36 = vector.extract_strided_slice %9 {offsets = [2, 0], sizes = [1, 256], strides = [1, 1]} : vector<6x256xf32> to vector<1x256xf32>
    %37 = vector.extract_strided_slice %10 {offsets = [2, 0], sizes = [1, 256], strides = [1, 1]} : vector<6x256xf32> to vector<1x256xf32>
    %38 = tpu.concatenate %11, %12, %13, %14, %15, %16, %17, %18, %19, %20, %21, %22, %23, %24, %25, %26 in 0 : vector<1x256xf32>, vector<1x256xf32>, vector<1x256xf32>, vector<1x256xf32>, vector<1x256xf32>, vector<1x256xf32>, vector<1x256xf32>, vector<1x256xf32>, vector<1x256xf32>, vector<1x256xf32>, vector<1x256xf32>, vector<1x256xf32>, vector<1x256xf32>, vector<1x256xf32>, vector<1x256xf32>, vector<1x256xf32> -> vector<16x256xf32>
    %39 = tpu.concatenate %27, %28, %29, %30, %31, %32, %33, %34, %35, %36, %37 in 0 : vector<1x256xf32>, vector<1x256xf32>, vector<1x256xf32>, vector<1x256xf32>, vector<1x256xf32>, vector<1x256xf32>, vector<1x256xf32>, vector<1x256xf32>, vector<1x256xf32>, vector<1x256xf32>, vector<1x256xf32> -> vector<11x256xf32>
    %40 = tpu.concatenate %38, %39 in 0 : vector<16x256xf32>, vector<11x256xf32> -> vector<27x256xf32>
    %cst = arith.constant dense<0.000000e+00> : vector<3x256xf32>
    %41 = tpu.matmul %1, %40, %cst {dimension_numbers = #tpu.dot_dimension_numbers<[1], [0], [0], [1], [0, 0, 1, 1], [], []>} : vector<3x27xf32>, vector<27x256xf32>, vector<3x256xf32> -> vector<3x256xf32>
    %42 = vector.broadcast %2 : vector<3x1xf32> to vector<3x256xf32>
    %43 = arith.addf %41, %42 : vector<3x256xf32>
    %44 = vector.extract_strided_slice %0 {offsets = [3, 0], sizes = [1, 256], strides = [1, 1]} : vector<6x256xf32> to vector<1x256xf32>
    %45 = vector.extract_strided_slice %3 {offsets = [3, 0], sizes = [1, 256], strides = [1, 1]} : vector<6x256xf32> to vector<1x256xf32>
    %46 = vector.extract_strided_slice %4 {offsets = [3, 0], sizes = [1, 256], strides = [1, 1]} : vector<6x256xf32> to vector<1x256xf32>
    %47 = vector.extract_strided_slice %5 {offsets = [3, 0], sizes = [1, 256], strides = [1, 1]} : vector<6x256xf32> to vector<1x256xf32>
    %48 = vector.extract_strided_slice %6 {offsets = [3, 0], sizes = [1, 256], strides = [1, 1]} : vector<6x256xf32> to vector<1x256xf32>
    %49 = vector.extract_strided_slice %7 {offsets = [3, 0], sizes = [1, 256], strides = [1, 1]} : vector<6x256xf32> to vector<1x256xf32>
    %50 = vector.extract_strided_slice %8 {offsets = [3, 0], sizes = [1, 256], strides = [1, 1]} : vector<6x256xf32> to vector<1x256xf32>
    %51 = vector.extract_strided_slice %9 {offsets = [3, 0], sizes = [1, 256], strides = [1, 1]} : vector<6x256xf32> to vector<1x256xf32>
    %52 = vector.extract_strided_slice %10 {offsets = [3, 0], sizes = [1, 256], strides = [1, 1]} : vector<6x256xf32> to vector<1x256xf32>
    %53 = vector.extract_strided_slice %0 {offsets = [4, 0], sizes = [1, 256], strides = [1, 1]} : vector<6x256xf32> to vector<1x256xf32>
    %54 = vector.extract_strided_slice %3 {offsets = [4, 0], sizes = [1, 256], strides = [1, 1]} : vector<6x256xf32> to vector<1x256xf32>
    %55 = vector.extract_strided_slice %4 {offsets = [4, 0], sizes = [1, 256], strides = [1, 1]} : vector<6x256xf32> to vector<1x256xf32>
    %56 = vector.extract_strided_slice %5 {offsets = [4, 0], sizes = [1, 256], strides = [1, 1]} : vector<6x256xf32> to vector<1x256xf32>
    %57 = vector.extract_strided_slice %6 {offsets = [4, 0], sizes = [1, 256], strides = [1, 1]} : vector<6x256xf32> to vector<1x256xf32>
    %58 = vector.extract_strided_slice %7 {offsets = [4, 0], sizes = [1, 256], strides = [1, 1]} : vector<6x256xf32> to vector<1x256xf32>
    %59 = vector.extract_strided_slice %8 {offsets = [4, 0], sizes = [1, 256], strides = [1, 1]} : vector<6x256xf32> to vector<1x256xf32>
    %60 = vector.extract_strided_slice %9 {offsets = [4, 0], sizes = [1, 256], strides = [1, 1]} : vector<6x256xf32> to vector<1x256xf32>
    %61 = vector.extract_strided_slice %10 {offsets = [4, 0], sizes = [1, 256], strides = [1, 1]} : vector<6x256xf32> to vector<1x256xf32>
    %62 = vector.extract_strided_slice %0 {offsets = [5, 0], sizes = [1, 256], strides = [1, 1]} : vector<6x256xf32> to vector<1x256xf32>
    %63 = vector.extract_strided_slice %3 {offsets = [5, 0], sizes = [1, 256], strides = [1, 1]} : vector<6x256xf32> to vector<1x256xf32>
    %64 = vector.extract_strided_slice %4 {offsets = [5, 0], sizes = [1, 256], strides = [1, 1]} : vector<6x256xf32> to vector<1x256xf32>
    %65 = vector.extract_strided_slice %5 {offsets = [5, 0], sizes = [1, 256], strides = [1, 1]} : vector<6x256xf32> to vector<1x256xf32>
    %66 = vector.extract_strided_slice %6 {offsets = [5, 0], sizes = [1, 256], strides = [1, 1]} : vector<6x256xf32> to vector<1x256xf32>
    %67 = vector.extract_strided_slice %7 {offsets = [5, 0], sizes = [1, 256], strides = [1, 1]} : vector<6x256xf32> to vector<1x256xf32>
    %68 = vector.extract_strided_slice %8 {offsets = [5, 0], sizes = [1, 256], strides = [1, 1]} : vector<6x256xf32> to vector<1x256xf32>
    %69 = vector.extract_strided_slice %9 {offsets = [5, 0], sizes = [1, 256], strides = [1, 1]} : vector<6x256xf32> to vector<1x256xf32>
    %70 = vector.extract_strided_slice %10 {offsets = [5, 0], sizes = [1, 256], strides = [1, 1]} : vector<6x256xf32> to vector<1x256xf32>
    %71 = tpu.concatenate %44, %45, %46, %47, %48, %49, %50, %51, %52, %53, %54, %55, %56, %57, %58, %59 in 0 : vector<1x256xf32>, vector<1x256xf32>, vector<1x256xf32>, vector<1x256xf32>, vector<1x256xf32>, vector<1x256xf32>, vector<1x256xf32>, vector<1x256xf32>, vector<1x256xf32>, vector<1x256xf32>, vector<1x256xf32>, vector<1x256xf32>, vector<1x256xf32>, vector<1x256xf32>, vector<1x256xf32>, vector<1x256xf32> -> vector<16x256xf32>
    %72 = tpu.concatenate %60, %61, %62, %63, %64, %65, %66, %67, %68, %69, %70 in 0 : vector<1x256xf32>, vector<1x256xf32>, vector<1x256xf32>, vector<1x256xf32>, vector<1x256xf32>, vector<1x256xf32>, vector<1x256xf32>, vector<1x256xf32>, vector<1x256xf32>, vector<1x256xf32>, vector<1x256xf32> -> vector<11x256xf32>
    %73 = tpu.concatenate %71, %72 in 0 : vector<16x256xf32>, vector<11x256xf32> -> vector<27x256xf32>
    %cst_5 = arith.constant dense<0.000000e+00> : vector<3x256xf32>
    %74 = tpu.matmul %1, %73, %cst_5 {dimension_numbers = #tpu.dot_dimension_numbers<[1], [0], [0], [1], [0, 0, 1, 1], [], []>} : vector<3x27xf32>, vector<27x256xf32>, vector<3x256xf32> -> vector<3x256xf32>
    %75 = vector.broadcast %2 : vector<3x1xf32> to vector<3x256xf32>
    %76 = arith.addf %74, %75 : vector<3x256xf32>
    %77 = tpu.concatenate %43, %76 in 0 : vector<3x256xf32>, vector<3x256xf32> -> vector<6x256xf32>
    %c0_6 = arith.constant 0 : index
    %c0_7 = arith.constant 0 : index
    %78 = vector.load %arg3[%c0_6, %c0_7] : memref<6x256xf32, #tpu.memory_space<vmem>>, vector<6x256xf32>
    tpu.vector_store %arg3[%c0_6, %c0_7], %77 {strides = array<i32>} : memref<6x256xf32, #tpu.memory_space<vmem>>, vector<6x256xf32>,
    return
  }
}

</mosaic_0001>

<bundles_post_ra>
// kernel: conv2d_3x3.1
= control target key start
LH: loop header
LB: loop body
LE: loop exit
PB: predicated region body
PF: predicated region fallthrough
CT: control target
= control target key end

     0   :  { %s508_s16 = smov 126   ;;  %s509_s17 = smov 127   ;;  %v516_v3 = vmov 0.0   ;;  %v517_v4 = vmov 0   ;;  %v22_v6 = vlaneseq  ;;  %vm118_vm2 = vcmask 1040384   ;;  %s876_s0 = inlined_call_operand.vmem [shape: f32[6,256], index: 0, kind: input, shape index: {}]   ;;  %s877_s2 = inlined_call_operand.vmem [shape: f32[3,1], index: 2, kind: input, shape index: {}]   ;;  %s878_s1 = inlined_call_operand.vmem [shape: f32[3,27], index: 1, kind: input, shape index: {}]   ;;  %s879_s3 = inlined_call_operand.vmem [shape: f32[6,256], index: 3, kind: output, shape index: {}]  }
   0x1   :  { %v542_v0 = vld [vmem:[%s876_s0] sm:$0x3f]  ;;  %v547_v1 = vld [vmem:[%s876_s0 + $0x8] sm:$0x3f]  ;;  %s510_s18 = smov 111   ;;  %s511_s19 = smov 94   ;;  %250 = vmatprep.mubr.f32.mxu0 %v516_v3  ;;  %409 = vmatprep.mubr.f32.mxu1 %v516_v3 }
   0x2   :  { %v477_v2 = vpack.i.bf16 %v547_v1, %v542_v0  ;;  %s512_s20 = smov 110   ;;  %s513_s21 = smov 112   ;;  %507 = vset.pattern.permute.xlu0 %v517_v4  ;;  %v17_v5 = vld [vmem:[%s877_s2] sm:$0x7]  ;;  %v554_v7 = vand.u32 127, %v22_v6  ;;  %v559_v9 = vrot.slane %v547_v1, 3 }
   0x3   :  { %s514_s22 = smov 96   ;;  %s515_s23 = smov 95   ;;  %vm121_vm3 = vcmask 1041408   ;;  %v562_v15 = vrot.slane %v542_v0, 3  ;;  %vm124_vm9 = vcmask 1042432   ;;  %vm127_vm11 = vcmask 1043456  }
   0x4   :  { %478 = vrot.lane.b32.xlu1 %v477_v2, %s508_s16  ;;  %468 = vrot.lane.b32.xlu0 %v477_v2, %s509_s17  ;;  %vm31_vm0 = vcmp.lt.s32.totalorder %v554_v7, 126  ;;  %vm24_vm1 = vcmp.lt.s32.totalorder %v554_v7, 127  ;;  %vm45_vm4 = vcmp.lt.s32.totalorder %v554_v7, 111  ;;  %vm73_vm5 = vcmp.lt.s32.totalorder %v554_v7, 94 }
   0x5   :  { %vm52_vm6 = vcmp.lt.s32.totalorder %v554_v7, 110  ;;  %vm38_vm7 = vcmp.lt.s32.totalorder %v554_v7, 112  ;;  %vm59_vm8 = vcmp.lt.s32.totalorder %v554_v7, 96  ;;  %vm66_vm10 = vcmp.lt.s32.totalorder %v554_v7, 95 }
   0x6   :  { %vm130_vm12 = vcmask 1044480   ;;  %vm133_vm13 = vcmask 1045504   ;;  %vm136_vm14 = vcmask 1046528   ;;  %vm518_vm15 = vmmov 1  }
   0x8   :  { %483 = vrot.lane.b32.xlu1 %v477_v2, %s510_s18  ;;  %473 = vrot.lane.b32.xlu0 %v477_v2, %s511_s19 }
   0xc   :  { %493 = vrot.lane.b32.xlu1 %v477_v2, %s512_s20  ;;  %488 = vrot.lane.b32.xlu0 %v477_v2, %s513_s21 }
  0x10   :  { %503 = vrot.lane.b32.xlu1 %v477_v2, %s514_s22  ;;  %498 = vrot.lane.b32.xlu0 %v477_v2, %s515_s23 }
  0x14   :  { %173 = vperm.xlu0 %507, %v17_v5  }
  0x76   :  { %v479_v8 = vpop.permute.xlu1 %478  ;;  %v469_v10 = vpop.permute.xlu0 %468 }
  0x77   :  { %v481_v11 = vunpack.i.h.bf16 %v479_v8  ;;  %v480_v12 = vunpack.i.l.bf16 %v479_v8  ;;  %v471_v13 = vunpack.i.h.bf16 %v469_v10  ;;  %v470_v14 = vunpack.i.l.bf16 %v469_v10 }
  0x79   :  { %v32_v16 = vsel %vm31_vm0, %v480_v12, %v481_v11  ;;  %v33_v17 = vsel %vm31_vm0, %v481_v11, %v480_v12  ;;  %v25_v18 = vsel %vm24_vm1, %v470_v14, %v471_v13  ;;  %v26_v19 = vsel %vm24_vm1, %v471_v13, %v470_v14  ;;  %vm825_vm0 = vmpackc.low %vm124_vm9, %vm518_vm15 }
  0x7a   :  { %v575_v20 = vrot.slane %v32_v16, 6  ;;  %v577_v21 = vrot.slane %v33_v17, 6  ;;  %v579_v22 = vrot.slane %v32_v16, 1  ;;  %v581_v23 = vrot.slane %v33_v17, 1  ;;  %v484_v24 = vpop.permute.xlu1 %483  ;;  %v474_v25 = vpop.permute.xlu0 %473 }
  0x7b   :  { %v585_v26 = vrot.slane %v25_v18, 7  ;;  %v587_v27 = vrot.slane %v26_v19, 7  ;;  %v589_v28 = vrot.slane %v25_v18, 2  ;;  %v591_v29 = vrot.slane %v26_v19, 2 }
  0x7c   :  { %v486_v30 = vunpack.i.h.bf16 %v484_v24  ;;  %v485_v31 = vunpack.i.l.bf16 %v484_v24  ;;  %v476_v32 = vunpack.i.h.bf16 %v474_v25  ;;  %v475_v33 = vunpack.i.l.bf16 %v474_v25 }
  0x7d   :  { %v596_v34 = vsel %vm118_vm2, %v542_v0, %v585_v26  ;;  %v120_v35 = vsel %vm118_vm2, %v547_v1, %v587_v27  ;;  %v293_v36 = vsel %vm118_vm2, %v562_v15, %v589_v28  ;;  %v294_v37 = vsel %vm118_vm2, %v559_v9, %v591_v29 }
  0x7e   :  { %v46_v38 = vsel %vm45_vm4, %v485_v31, %v486_v30  ;;  %v47_v39 = vsel %vm45_vm4, %v486_v30, %v485_v31  ;;  %v613_v40 = vsel %vm73_vm5, %v475_v33, %v476_v32  ;;  %v617_v41 = vsel %vm73_vm5, %v476_v32, %v475_v33  ;;  %v494_v42 = vpop.permute.xlu1 %493  ;;  %v489_v43 = vpop.permute.xlu0 %488 }
  0x7f   :  { %v620_v44 = vrot.slane %v46_v38, 4  ;;  %v622_v45 = vrot.slane %v47_v39, 4  ;;  %v624_v46 = vrot.slane %v46_v38, 7  ;;  %v626_v47 = vrot.slane %v47_v39, 7 }
  0x80   :  { %v139_v48 = vsel %vm118_vm2, %v613_v40, %v542_v0  ;;  %v140_v49 = vsel %vm118_vm2, %v617_v41, %v547_v1  ;;  %v635_v50 = vrot.slane %v613_v40, 3  ;;  %v638_v51 = vrot.slane %v617_v41, 3 }
  0x81   :  { %v642_v52 = vsel %vm121_vm3, %v139_v48, %v585_v26  ;;  %v496_v53 = vunpack.i.h.bf16 %v494_v42  ;;  %v495_v54 = vunpack.i.l.bf16 %v494_v42  ;;  %v491_v55 = vunpack.i.h.bf16 %v489_v43 }
  0x82   :  { %v647_v56 = vsel %vm118_vm2, %v635_v50, %v562_v15  ;;  %v490_v57 = vunpack.i.l.bf16 %v489_v43  ;;  %v295_v58 = vsel %vm121_vm3, %v293_v36, %v579_v22  ;;  %v504_v59 = vpop.permute.xlu1 %503  ;;  %v123_v60 = vsel %vm121_vm3, %v120_v35, %v577_v21  ;;  %v499_v8 = vpop.permute.xlu0 %498 }
  0x83   :  { %v53_v61 = vsel %vm52_vm6, %v495_v54, %v496_v53  ;;  %v54_v62 = vsel %vm52_vm6, %v496_v53, %v495_v54  ;;  %v506_v63 = vunpack.i.h.bf16 %v504_v59  ;;  %v505_v2 = vunpack.i.l.bf16 %v504_v59 }
  0x84   :  { %v657_v3 = vrot.slane %v53_v61, 3  ;;  %v659_v4 = vrot.slane %v54_v62, 3  ;;  %v661_v5 = vrot.slane %v53_v61, 6  ;;  %v663_v6 = vrot.slane %v54_v62, 6 }
  0x85   :  { %v667_v10 = vsel %vm38_vm7, %v490_v57, %v491_v55  ;;  %v671_v11 = vsel %vm38_vm7, %v491_v55, %v490_v57  ;;  %v60_v12 = vsel %vm59_vm8, %v505_v2, %v506_v63  ;;  %v61_v13 = vsel %vm59_vm8, %v506_v63, %v505_v2 }
  0x86   :  { %v678_v14 = vrot.slane %v667_v10, 5  ;;  %v681_v16 = vrot.slane %v671_v11, 5  ;;  %v685_v17 = vsel %vm124_vm9, %v295_v58, %v667_v10  ;;  %v687_v18 = vrot.slane %v60_v12, 2 }
  0x87   :  { %v689_v19 = vrot.slane %v60_v12, 5  ;;  %v501_v24 = vunpack.i.h.bf16 %v499_v8  ;;  %v500_v25 = vunpack.i.l.bf16 %v499_v8  ;;  %v109_v30 = vrot.slane %v61_v13, 2 }
  0x88   :  { %v126_v31 = vsel %vm124_vm9, %v123_v60, %v681_v16  ;;  %v142_v32 = vsel %vm121_vm3, %v140_v49, %v587_v27  ;;  %v280_v33 = vrot.slane %v61_v13, 5  ;;  %v296_v35 = vsel %vm121_vm3, %v294_v37, %v581_v23 }
  0x89   :  { %v67_v36 = vsel %vm66_vm10, %v500_v25, %v501_v24  ;;  %v68_v38 = vsel %vm66_vm10, %v501_v24, %v500_v25  ;;  %v129_v39 = vsel %vm127_vm11, %v126_v31, %v622_v45  ;;  %v144_v42 = vsel %vm124_vm9, %v142_v32, %v577_v21 }
  0x8a   :  { %v115_v43 = vrot.slane %v68_v38, 1  ;;  %v132_v48 = vsel %vm130_vm12, %v129_v39, %v659_v4  ;;  %v146_v49 = vsel %vm127_vm11, %v144_v42, %v681_v16  ;;  %v284_v37 = vrot.slane %v68_v38, 4 }
  0x8b   :  { %v135_v53 = vsel %vm133_vm13, %v132_v48, %v109_v30  ;;  %v148_v7 = vsel %vm130_vm12, %v146_v49, %v622_v45  ;;  %v298_v54 = vsel %vm124_vm9, %v296_v35, %v671_v11  ;;  %v308_v55 = vsel %vm118_vm2, %v638_v51, %v559_v9 }
  0x8c   :  { %v138_v57 = vsel %vm136_vm14, %v135_v53, %v115_v43  ;;  %v150_v58 = vsel %vm133_vm13, %v148_v7, %v659_v4  ;;  %v154_v59 = vsel %vm118_vm2, %v115_v43, %v617_v41  ;;  %v168_v60 = vsel %vm118_vm2, %v109_v30, %v115_v43 }
  0x8d   :  { %v152_v61 = vsel %vm136_vm14, %v150_v58, %v109_v30  ;;  %v156_v62 = vsel %vm121_vm3, %v154_v59, %v547_v1  ;;  %v300_v63 = vsel %vm127_vm11, %v298_v54, %v626_v47  ;;  %v310_v2 = vsel %vm121_vm3, %v308_v55, %v591_v29 }
  0x8e   :  { %v158_v8 = vsel %vm124_vm9, %v156_v62, %v587_v27  ;;  %v436_v12 = vpack.c.bf16 %v152_v61, %v138_v57  ;;  %v302_v13 = vsel %vm130_vm12, %v300_v63, %v663_v6  ;;  %v312_v24 = vsel %vm124_vm9, %v310_v2, %v581_v23 }
  0x8f   :  { %v304_v25 = vsel %vm133_vm13, %v302_v13, %v280_v33  ;;  %v314_v1 = vsel %vm127_vm11, %v312_v24, %v671_v11  ;;  %v322_v30 = vsel %vm118_vm2, %v284_v37, %v638_v51  ;;  %v336_v31 = vsel %vm118_vm2, %v280_v33, %v284_v37 }
  0x90   :  { %437 = vmatprep.subr.bf16.mxu0 %v436_v12  ;;  %v306_v27 = vsel %vm136_vm14, %v304_v25, %v284_v37  ;;  %v316_v32 = vsel %vm130_vm12, %v314_v1, %v626_v47  ;;  %v324_v35 = vsel %vm121_vm3, %v322_v30, %v559_v9  ;;  %v114_v38 = vrot.slane %v67_v36, 1 }
  0x91   :  { %v318_v39 = vsel %vm133_vm13, %v316_v32, %v663_v6  ;;  %v326_v42 = vsel %vm124_vm9, %v324_v35, %v591_v29  ;;  %v122_v43 = vsel %vm121_vm3, %v596_v34, %v575_v20  ;;  %v143_v48 = vsel %vm124_vm9, %v642_v52, %v575_v20 }
  0x92   :  { %v320_v49 = vsel %vm136_vm14, %v318_v39, %v280_v33  ;;  %v125_v9 = vsel %vm124_vm9, %v122_v43, %v678_v14  ;;  %v145_v37 = vsel %vm127_vm11, %v143_v48, %v678_v14  ;;  %v153_v53 = vsel %vm118_vm2, %v114_v38, %v613_v40 }
  0x93   :  { %v446_v29 = vpack.c.bf16 %v320_v49, %v306_v27  ;;  %v128_v7 = vsel %vm127_vm11, %v125_v9, %v620_v44  ;;  %v147_v34 = vsel %vm130_vm12, %v145_v37, %v620_v44  ;;  %v155_v52 = vsel %vm121_vm3, %v153_v53, %v542_v0 }
  0x94   :  { %v131_v33 = vsel %vm130_vm12, %v128_v7, %v657_v3  ;;  %v149_v54 = vsel %vm133_vm13, %v147_v34, %v657_v3  ;;  %v157_v55 = vsel %vm124_vm9, %v155_v52, %v585_v26  ;;  %v283_v57 = vrot.slane %v67_v36, 4 }
  0x95   :  { %447 = vmatprep.subr.bf16.mxu1 %v446_v29  ;;  %v134_v58 = vsel %vm133_vm13, %v131_v33, %v687_v18  ;;  %v151_v59 = vsel %vm136_vm14, %v149_v54, %v687_v18  ;;  %v299_v0 = vsel %vm127_vm11, %v685_v17, %v624_v46  ;;  %v309_v61 = vsel %vm121_vm3, %v647_v56, %v589_v28 }
  0x96   :  { %v137_v62 = vsel %vm136_vm14, %v134_v58, %v114_v38  ;;  %v301_v26 = vsel %vm130_vm12, %v299_v0, %v661_v5  ;;  %v311_v36 = vsel %vm124_vm9, %v309_v61, %v579_v22  ;;  %v321_v63 = vsel %vm118_vm2, %v283_v57, %v635_v50 }
  0x97   :  { %v438_v2 = vpack.c.bf16 %v151_v59, %v137_v62  ;;  %v303_v12 = vsel %vm133_vm13, %v301_v26, %v689_v19  ;;  %v313_v17 = vsel %vm127_vm11, %v311_v36, %v667_v10  ;;  %v323_v56 = vsel %vm121_vm3, %v321_v63, %v562_v15 }
  0x98   :  { %v305_v13 = vsel %vm136_vm14, %v303_v12, %v283_v57  ;;  %v315_v24 = vsel %vm130_vm12, %v313_v17, %v624_v46  ;;  %v325_v25 = vsel %vm124_vm9, %v323_v56, %v589_v28  ;;  %v160_v1 = vsel %vm127_vm11, %v158_v8, %v577_v21 }
  0x99   :  { %439 = vmatpush1.bf16.msra.mxu0 %v438_v2  ;;  %v317_v30 = vsel %vm133_vm13, %v315_v24, %v661_v5  ;;  %v162_v27 = vsel %vm130_vm12, %v160_v1, %v681_v16  ;;  %v170_v15 = vsel %vm121_vm3, %v168_v60, %v617_v41  ;;  %v328_v32 = vsel %vm127_vm11, %v326_v42, %v581_v23 }
  0x9a   :  { %v319_v35 = vsel %vm136_vm14, %v317_v30, %v689_v19  ;;  %v164_v28 = vsel %vm133_vm13, %v162_v27, %v622_v45  ;;  %v330_v21 = vsel %vm130_vm12, %v328_v32, %v671_v11  ;;  %v338_v8 = vsel %vm121_vm3, %v336_v31, %v638_v51 }
  0x9b   :  { %v448_v39 = vpack.c.bf16 %v319_v35, %v305_v13  ;;  %v166_v16 = vsel %vm136_vm14, %v164_v28, %v659_v4  ;;  %v332_v41 = vsel %vm133_vm13, %v330_v21, %v626_v47  ;;  %v159_v45 = vsel %vm127_vm11, %v157_v55, %v575_v20 }
  0x9c   :  { %v440_v11 = vpack.c.bf16 %v170_v15, %v166_v16  ;;  %v334_v51 = vsel %vm136_vm14, %v332_v41, %v663_v6  ;;  %v161_v60 = vsel %vm130_vm12, %v159_v45, %v678_v14  ;;  %v167_v4 = vsel %vm118_vm2, %v687_v18, %v114_v38 }
  0x9d   :  { %449 = vmatpush1.bf16.msra.mxu1 %v448_v39  ;;  %v450_v31 = vpack.c.bf16 %v338_v8, %v334_v51  ;;  %v163_v42 = vsel %vm133_vm13, %v161_v60, %v620_v44  ;;  %v327_v47 = vsel %vm127_vm11, %v325_v25, %v579_v22  ;;  %v169_v6 = vsel %vm121_vm3, %v167_v4, %v613_v40 }
  0x9e   :  { %442 = vmatprep.subr.msk.bf16.mxu0 %vm825_vm0, %v440_v11  ;;  %v165_v20 = vsel %vm136_vm14, %v163_v42, %v657_v3  ;;  %v329_v14 = vsel %vm130_vm12, %v327_v47, %v667_v10  ;;  %v335_v18 = vsel %vm118_vm2, %v689_v19, %v283_v57  ;;  %v16_v10 = vld [vmem:[%s878_s1] sm:$0x7]  ;;  %vm176_vm1 = vcmask 220160  }
  0x9f   :  { %452 = vmatprep.subr.msk.bf16.mxu1 %vm825_vm0, %v450_v31  ;;  %v443_v44 = vpack.c.bf16 %v169_v6, %v165_v20  ;;  %v331_v22 = vsel %vm133_vm13, %v329_v14, %v624_v46  ;;  %v337_v3 = vsel %vm121_vm3, %v335_v18, %v635_v50  ;;  %v174_v46 = vpop.permute.xlu0 %173 }
  0xa0   :  { %v333_v38 = vsel %vm136_vm14, %v331_v22, %v661_v5 }
  0xa1   :  { %445 = vmatpush1.bf16.msk.msra.mxu0 %vm825_vm0, %v443_v44  ;;  %v453_v40 = vpack.c.bf16 %v337_v3, %v333_v38 }
  0xa3   :  { %455 = vmatpush1.bf16.msk.msra.mxu1 %vm825_vm0, %v453_v40 }
  0xa4   :  { %432 = vmatmul.mubr.msk.f32.vlgmr.msra.gmra.mrb[0].mxu0 %vm176_vm1, %v16_v10 }
  0xa6   :  { %435 = vmatmul.mubr.msk.f32.vlgmr.msra.gmra.mrb[0].mxu1 %vm176_vm1, %v16_v10 }
 0x177   :  { %v252_v19 = vpop.f32.mrb[0].mxu0 }
 0x178   :  { %v254_v5 = vpop.f32.mrb[1].mxu0  ;;  %v253_v48 = vadd.f32 %v252_v19, %v174_v46 }
 0x179   :  { %v411_v43 = vpop.f32.mrb[0].mxu1  ;;  %v255_v53 = vadd.f32 %v254_v5, %v174_v46 }
 0x17a   :  { %v412_v50 = vadd.f32 %v411_v43, %v174_v46  ;;  %v413_v49 = vpop.f32.mrb[1].mxu1 }
 0x17b   :  { %v414_v9 = vadd.f32 %v413_v49, %v174_v46 }
 0x17c   :  { %v418_v37 = vrot.slane %v412_v50, 5 }
 0x17d   :  { %v419_v29 = vrot.slane %v414_v9, 5 }
 0x17e   :  { %v422_v7 = vsel %vm124_vm9, %v253_v48, %v418_v37 }
 0x17f   :  { %424 = vst [vmem:[%s879_s3] sm:$0x3f] %v422_v7  ;;  %v423_v34 = vsel %vm124_vm9, %v255_v53, %v419_v29 }
 0x180   :  { %425 = vst [vmem:[%s879_s3 + $0x8] sm:$0x3f] %v423_v34 }

</bundles_post_ra>
